<compile_context>
chip_gen: v5e
topology: v5e:2x2
jax: 0.10.0
libtpu: 0.0.40
codegen_flags: <defaults>
</compile_context>

<pallas_src>
import functools

import jax
import jax.numpy as jnp
from jax import lax
from jax.experimental import pallas as pl
from jax.experimental.pallas import tpu as pltpu

_LANE = 128


def _round_down(x, m):
    return (x // m) * m


def _l1_partial_kernel(inf_ref, tgt_ref, out_ref, *, n_chunks, acc_rows):
    """Accumulate sum(|inf - tgt|) of this (br, 128) block into the resident
    (acc_rows, 128) per-core partial-sum output block (elementwise VPU adds only;
    the single cross-lane reduce happens once in the wrapper)."""

    @pl.when(pl.program_id(1) == 0)
    def _():
        out_ref[...] = jnp.zeros_like(out_ref)

    def body(i, acc):
        s = pl.multiple_of(i * acc_rows, acc_rows)
        a = inf_ref[pl.ds(s, acc_rows), :].astype(jnp.float32)
        b = tgt_ref[pl.ds(s, acc_rows), :].astype(jnp.float32)
        return acc + jnp.abs(a - b)

    acc = lax.fori_loop(
        0, n_chunks, body,
        jnp.zeros((acc_rows, _LANE), jnp.float32),
        unroll=True,
    )
    out_ref[...] += acc


def reconstruction_loss(inferred_image, target_image, *, block_rows=4096, num_cores=1):
    """Pallas-TPU equivalent of torch.nn.L1Loss()(inferred, target): mean(|a - b|).

    Defaults (block_rows=4096, num_cores=1) target v5e/v6e.  On v7x pass
    block_rows=8192, num_cores=2 to use both TensorCores and the 3.2 TB/s HBM.
    """
    assert inferred_image.shape == target_image.shape
    total = int(inferred_image.size)
    if total == 0:
        return jnp.float32(0.0)

    itemsize = jnp.dtype(inferred_image.dtype).itemsize
    sub = max(8, 32 // itemsize)  # sublane multiple: 8 f32 / 16 bf16 / 32 int8-fp8

    a_flat = jnp.reshape(inferred_image, (-1,))   # free (row-major flatten)
    b_flat = jnp.reshape(target_image, (-1,))

    def _tail_sum(a, b):
        return jnp.sum(jnp.abs(a.astype(jnp.float32) - b.astype(jnp.float32)))

    rows = total // _LANE
    # Tiny-input fallback: not even one full (sub, 128) tile -> plain jnp.
    if rows < sub:
        return _tail_sum(a_flat, b_flat) / total

    # ---- static block geometry ----
    if rows >= 64:
        acc_rows = 64                                            # 8 independent vreg add chains
        br = max(64, _round_down(min(block_rows, rows), 64))     # multiple of 64 (>= sub for any dtype)
    else:
        br = _round_down(rows, sub)                              # small input: one block
        acc_rows = br
    n_chunks = br // acc_rows

    num_blocks = rows // br
    nc = max(1, min(num_cores, num_blocks))
    nj = num_blocks // nc
    main_blocks = nc * nj
    rows_main = main_blocks * br
    main_elems = rows_main * _LANE

    # Lane-dense 2-D views.  When total % 128 == 0 (the usual case for image
    # tensors) this is a pure reshape — no HBM copy at all.
    if total % _LANE == 0:
        a2 = a_flat.reshape(rows, _LANE)
        b2 = b_flat.reshape(rows, _LANE)
        rem_sum = jnp.float32(0.0)
    else:
        # Rare path: one copy of the 128-aligned prefix; <128-elem remainder via jnp.
        a2 = lax.slice(a_flat, (0,), (rows * _LANE,)).reshape(rows, _LANE)
        b2 = lax.slice(b_flat, (0,), (rows * _LANE,)).reshape(rows, _LANE)
        rem_sum = _tail_sum(a_flat[rows * _LANE:], b_flat[rows * _LANE:])

    kernel = functools.partial(_l1_partial_kernel, n_chunks=n_chunks, acc_rows=acc_rows)

    partials = pl.pallas_call(
        kernel,
        out_shape=jax.ShapeDtypeStruct((nc * acc_rows, _LANE), jnp.float32),
        grid_spec=pltpu.PrefetchScalarGridSpec(
            num_scalar_prefetch=0,
            grid=(nc, nj),
            in_specs=[
                pl.BlockSpec((br, _LANE), lambda c, j: (c * nj + j, 0)),
                pl.BlockSpec((br, _LANE), lambda c, j: (c * nj + j, 0)),
            ],
            out_specs=pl.BlockSpec((acc_rows, _LANE), lambda c, j: (c, 0)),
        ),
        compiler_params=pltpu.CompilerParams(
            dimension_semantics=("parallel", "arbitrary"),
        ),
        cost_estimate=pl.CostEstimate(
            flops=3 * main_elems,
            transcendentals=0,
            bytes_accessed=2 * main_elems * itemsize + nc * acc_rows * _LANE * 4,
        ),
    )(a2, b2)

    acc_sum = jnp.sum(partials)

    # Full 128-lane rows not covered by whole (br, 128) blocks (< br of them).
    if rows_main < rows:
        acc_sum = acc_sum + _tail_sum(a2[rows_main:], b2[rows_main:])

    return (acc_sum + rem_sum) / total


def _reference_loss(inferred, target):
    """Pure-JAX reference matching nn.L1Loss (mean reduction)."""
    return jnp.mean(jnp.abs(inferred - target))


if __name__ == "__main__":
    key = jax.random.PRNGKey(0)
    k1, k2 = jax.random.split(key)
    # Small NCHW shapes consistent with an image-reconstruction loss.
    shape = (2, 4, 16, 16)
    inferred = jax.random.uniform(k1, shape, dtype=jnp.float32)
    target = jax.random.uniform(k2, shape, dtype=jnp.float32)

    loss = jax.block_until_ready(reconstruction_loss(inferred, target))
    ref = jax.block_until_ready(_reference_loss(inferred, target))
    assert jnp.allclose(loss, ref, rtol=1e-5, atol=1e-6), (loss, ref)

    print("KERNEL_OK")
</pallas_src>

<mosaic_0001>
module attributes {stable_mosaic.version = 11 : i64} {
  func.func @_l1_partial_kernel(%arg0: i32, %arg1: i32, %arg2: memref<16x128xf32, #tpu.memory_space<vmem>>, %arg3: memref<16x128xf32, #tpu.memory_space<vmem>>, %arg4: memref<16x128xf32, #tpu.memory_space<vmem>>) attributes {dimension_semantics = [#tpu.dimension_semantics<parallel>, #tpu.dimension_semantics<arbitrary>], iteration_bounds = array<i64: 1, 1>, scalar_prefetch = 0 : i64, scratch_operands = 0 : i64, tpu.core_type = #tpu.core_type<tc>, window_params = [{transform_indices = @transform_0, window_bounds = array<i64: 16, 128>}, {transform_indices = @transform_1, window_bounds = array<i64: 16, 128>}, {transform_indices = @transform_2, window_bounds = array<i64: 16, 128>}]} {
    %c0_i32 = arith.constant 0 : i32
    %0 = arith.cmpi eq, %arg1, %c0_i32 : i32
    %1 = arith.extui %0 : i1 to i32
    %c0_i32_0 = arith.constant 0 : i32
    %2 = arith.cmpi ne, %1, %c0_i32_0 : i32
    scf.if %2 {
      %cst_7 = arith.constant 0.000000e+00 : f32
      %16 = vector.broadcast %cst_7 : f32 to vector<16x128xf32>
      %c0_8 = arith.constant 0 : index
      %c0_9 = arith.constant 0 : index
      %17 = vector.load %arg4[%c0_8, %c0_9] : memref<16x128xf32, #tpu.memory_space<vmem>>, vector<16x128xf32>
      tpu.vector_store %arg4[%c0_8, %c0_9], %16 {strides = array<i32>} : memref<16x128xf32, #tpu.memory_space<vmem>>, vector<16x128xf32>,
    } else {
    }
    %cst = arith.constant 0.000000e+00 : f32
    %3 = vector.broadcast %cst : f32 to vector<16x128xf32>
    %c0_i32_1 = arith.constant 0 : i32
    %c16_i32 = arith.constant 16 : i32
    %4 = arith.muli %c0_i32_1, %c16_i32 : i32
    %5 = tpu.assume_multiple %4, 16 : i32
    %6 = arith.index_cast %5 : i32 to index
    %c0 = arith.constant 0 : index
    %7 = vector.load %arg2[%6, %c0] : memref<16x128xf32, #tpu.memory_space<vmem>>, vector<16x128xf32>
    %8 = arith.index_cast %5 : i32 to index
    %c0_2 = arith.constant 0 : index
    %9 = vector.load %arg3[%8, %c0_2] : memref<16x128xf32, #tpu.memory_space<vmem>>, vector<16x128xf32>
    %10 = arith.subf %7, %9 : vector<16x128xf32>
    %11 = math.absf %10 : vector<16x128xf32>
    %12 = arith.addf %3, %11 : vector<16x128xf32>
    %c1_i32 = arith.constant 1 : i32
    %c0_3 = arith.constant 0 : index
    %c0_4 = arith.constant 0 : index
    %13 = vector.load %arg4[%c0_3, %c0_4] : memref<16x128xf32, #tpu.memory_space<vmem>>, vector<16x128xf32>
    %14 = arith.addf %13, %12 : vector<16x128xf32>
    %c0_5 = arith.constant 0 : index
    %c0_6 = arith.constant 0 : index
    %15 = vector.load %arg4[%c0_5, %c0_6] : memref<16x128xf32, #tpu.memory_space<vmem>>, vector<16x128xf32>
    tpu.vector_store %arg4[%c0_5, %c0_6], %14 {strides = array<i32>} : memref<16x128xf32, #tpu.memory_space<vmem>>, vector<16x128xf32>,
    return
  }
  func.func @transform_0(%arg0: i32, %arg1: i32) -> (i32, i32) {
    %c1_i32 = arith.constant 1 : i32
    %0 = arith.muli %arg0, %c1_i32 : i32
    %1 = arith.addi %0, %arg1 : i32
    %c0_i32 = arith.constant 0 : i32
    %c0_i32_0 = arith.constant 0 : i32
    return %1, %c0_i32 : i32, i32
  }
  func.func @transform_1(%arg0: i32, %arg1: i32) -> (i32, i32) {
    %c1_i32 = arith.constant 1 : i32
    %0 = arith.muli %arg0, %c1_i32 : i32
    %1 = arith.addi %0, %arg1 : i32
    %c0_i32 = arith.constant 0 : i32
    %c0_i32_0 = arith.constant 0 : i32
    return %1, %c0_i32 : i32, i32
  }
  func.func @transform_2(%arg0: i32, %arg1: i32) -> (i32, i32) {
    %c0_i32 = arith.constant 0 : i32
    %c0_i32_0 = arith.constant 0 : i32
    return %arg0, %c0_i32 : i32, i32
  }
}

</mosaic_0001>

<bundles_post_ra>
// kernel: tpu_custom_call.1
= control target key start
LH: loop header
LB: loop body
LE: loop exit
PB: predicated region body
PF: predicated region fallthrough
CT: control target
= control target key end

     0   :  { %7 = vsyncpa [#allocation3], 0  ;;  %s220_s0 = inlined_call_operand.hbm [shape: f32[16,128], index: 0, kind: input, shape index: {}]   ;;  %s221_s1 = inlined_call_operand.hbm [shape: f32[16,128], index: 1, kind: input, shape index: {}]   ;;  %s222_s2 = inlined_call_operand.hbm [shape: f32[16,128], index: 2, kind: output, shape index: {}]  }
   0x1   :  { %8 = vsyncpa [#allocation6], 0 }
   0x2   :  { %9 = vsyncpa [#allocation4], 0  ;;  %s18_s11 = sshll.u32 %s220_s0, 4  ;;  %s182_s12 = smov [#allocation2]   ;;  %s19_s11 = int_to_ptr.hbm [resolvable:$true] %s18_s11 }
   0x3   :  { %s20_s13 = sshll.u32 %s182_s12, 4  ;;  %s35_s16 = sshll.u32 %s221_s1, 4  ;;  %s21_s13 = int_to_ptr.vmem [resolvable:$true] %s20_s13  ;;  %s36_s16 = int_to_ptr.hbm [resolvable:$true] %s35_s16 }
   0x4   :  { %s183_s17 = smov 128   ;;  %s184_s18 = smov 8  }
   0x5   :  { %26 = dma.hbm_to_vmem [thread:$0]  %s19_s11, 256, %s21_s13, [#allocation3], %s183_s17, %s183_s17, %s184_s18  }
   0x6   :  { %s185_s19 = smov [#allocation5]  }
   0x7   :  { %s37_s20 = sshll.u32 %s185_s19, 4  ;;  %s38_s20 = int_to_ptr.vmem [resolvable:$true] %s37_s20 }
   0x8   :  { %43 = dma.hbm_to_vmem [thread:$0]  %s36_s16, 256, %s38_s20, [#allocation6], %s183_s17, %s183_s17, %s184_s18  }
   0x9   :  { %176 = dma.done.wait [#allocation3], 256  }
   0xa   :  { %177 = vsyncadd [#allocation3], 4294967040 }
   0xb   :  { %178 = dma.done.wait [#allocation6], 256  }
   0xc   :  { %179 = vsyncadd [#allocation6], 4294967040  ;;  %v62_v0 = vld [vmem:[#allocation2] sm:$0xff]  ;;  %v64_v1 = vld [vmem:[#allocation5] sm:$0xff]  ;;  %s186_s0 = smov [#allocation7]   ;;  %s84_s23 = sshll.u32 %s222_s2, 4  ;;  %s85_s23 = int_to_ptr.hbm [resolvable:$true] %s84_s23 }
   0xd   :  { %v63_v2 = vld [vmem:[#allocation2 + $0x8] sm:$0xff]  ;;  %v66_v3 = vsub.f32 %v62_v0, %v64_v1  ;;  %v65_v4 = vld [vmem:[#allocation5 + $0x8] sm:$0xff]  ;;  %s82_s1 = sshll.u32 %s186_s0, 4  ;;  %s83_s1 = int_to_ptr.vmem [resolvable:$true] %s82_s1 }
   0xe   :  { %v67_v5 = vsub.f32 %v63_v2, %v65_v4 }
   0xf   :  { %v68_v6 = vand.u32 2147483647, %v66_v3 }
  0x10   :  { %v69_v7 = vand.u32 2147483647, %v67_v5 }
  0x11   :  { %76 = vst [vmem:[#allocation7] sm:$0xff] %v68_v6 }
  0x12   :  { %77 = vst [vmem:[#allocation7 + $0x8] sm:$0xff] %v69_v7 }
  0x13   :  { %90 = dma.vmem_to_hbm [thread:$0]  %s83_s1, 256, %s85_s23, [#allocation4], %s183_s17, %s183_s17, %s184_s18  }
  0x14   :  { %180 = dma.done.wait [#allocation4], 256  }
  0x15   :  { %181 = vsyncadd [#allocation4], 4294967040 }
  0x16   :  { %95 = vsyncpa [#allocation3], 1 }
  0x17   :  { %96 = vsyncpa [#allocation6], 1 }
  0x18   :  { %97 = vsyncpa [#allocation4], 1 }

</bundles_post_ra>
